<compile_context>
chip_gen: v5e
topology: v5e:2x2
jax: 0.10.0
libtpu: 0.0.40
codegen_flags: <defaults>
</compile_context>

<pallas_src>
import functools

import jax
import jax.numpy as jnp
from jax.experimental import pallas as pl
from jax.experimental.pallas import tpu as pltpu

HIDDEN = 128        # width of every hidden Linear in the torch module
LANE = 128          # TPU lane width
SUBLANE = 8         # f32 sublane count
BF16_SUBLANE = 16   # bf16 sublane packing (2 rows per 32-bit word)


def _round_up(x, m):
    return (x + m - 1) // m * m


def _qnet_kernel(x_ref, wfold_ref, wb1_ref, bias_ref, out_ref, *,
                 b_real, action_size):
    """Fused dueling-DQN forward; one grid point, everything VMEM-resident.

    wfold = [W1 (rows zero-padded) ; Wh]    (s_pad + 256, 128) bf16
            Wh[:, j<A] = [Wa2[:, j] ; Wv2]  (value folded into adv columns)
            Wh[:, A]   = [0         ; Wv2]  (plain value, used for the mean)
    wb1   = [Wa1 | Wv1]                     (128, 256) bf16
    bias  = [b1 | ba1|bv1 | bh | colmask]   (1, 640) f32

    feature : h  = relu(x @ W1 + b1)                     (Bp, 128)
    branches: hb = relu(h @ [Wa1|Wv1] + [ba1|bv1])       (Bp, 256) = [ha | hv]
    heads   : y2 = hb @ Wh + bh                          (Bp, 128) lane-dense
              y2[:, j<A] = adv[:, j] + val ;  y2[:, A] = val
    output  : y2 - mean(adv)   (scalar mean over real B x A, as in torch)
    """
    s_pad = x_ref.shape[1]
    p_out = out_ref.shape[1]

    # Static lane/sublane-aligned views into the fused operands (zero-cost).
    w1 = wfold_ref[0:s_pad, :]
    wh = wfold_ref[s_pad:s_pad + 2 * HIDDEN, :]
    b1 = bias_ref[:, 0:HIDDEN]
    bb1 = bias_ref[:, HIDDEN:3 * HIDDEN]
    bh = bias_ref[:, 3 * HIDDEN:3 * HIDDEN + p_out]
    colmask = bias_ref[:, 3 * HIDDEN + p_out:3 * HIDDEN + 2 * p_out]

    # Three bf16 MXU matmuls with f32 accumulation.
    x = x_ref[...].astype(jnp.bfloat16)
    h = jnp.dot(x, w1, preferred_element_type=jnp.float32) + b1
    h = jnp.maximum(h, 0.0)

    hb = jnp.dot(h.astype(jnp.bfloat16), wb1_ref[...],
                 preferred_element_type=jnp.float32) + bb1
    hb = jnp.maximum(hb, 0.0)

    y2 = jnp.dot(hb.astype(jnp.bfloat16), wh,
                 preferred_element_type=jnp.float32) + bh

    # Scalar advantage mean over the REAL batch rows and the A advantage
    # columns. colmask = [1]*A + [-A] + [0]*pad, so per row
    #   sum_j colmask[j] * y2[b, j] = sum_{j<A} (adv + val) - A*val = sum adv.
    bp = y2.shape[0]
    row = jax.lax.broadcasted_iota(jnp.int32, (bp, 1), 0)
    rowmask = jnp.where(row < b_real, 1.0, 0.0)                       # (Bp, 1)
    row_adv_sum = jnp.sum(y2 * colmask, axis=-1, keepdims=True)       # (Bp, 1)
    adv_mean = jnp.sum(row_adv_sum * rowmask, axis=0, keepdims=True) * (
        1.0 / float(b_real * action_size))                            # (1, 1)

    # Lane-dense store: columns [:A] hold the real result; wrapper slices.
    out_ref[...] = y2 - adv_mean


def fuse_params(p):
    """One-time host-side prep (NOT per call): fuse branches, fold the value
    head into the advantage columns, stack W1 onto the head weight, store the
    weights bf16, and pack all biases + the mean column-mask into one vector.
    """
    f32 = jnp.float32
    state_size, _ = p["w1"].shape
    action_size = p["wa2"].shape[1]
    p_out = _round_up(action_size + 1, LANE)
    assert p_out == HIDDEN, "fused layout assumes action_size < 128"
    s_pad = _round_up(state_size, BF16_SUBLANE)
    pad_cols = p_out - (action_size + 1)

    # Branch first layers: hb = relu(h @ [Wa1 | Wv1] + [ba1 | bv1]).
    wb1 = jnp.concatenate([p["wa1"], p["wv1"]], axis=1).astype(jnp.bfloat16)  # (128,256)
    bb1 = jnp.concatenate([p["ba1"], p["bv1"]], axis=1)                       # (1,256)

    # Heads, block-stacked over hb = [ha | hv], value folded into adv columns.
    wv2_rep = jnp.broadcast_to(p["wv2"], (HIDDEN, action_size))
    wh_top = jnp.concatenate([p["wa2"], jnp.zeros((HIDDEN, 1), f32)], axis=1)  # (128, A+1)
    wh_bot = jnp.concatenate([wv2_rep, p["wv2"]], axis=1)                      # (128, A+1)
    wh = jnp.concatenate([wh_top, wh_bot], axis=0)                             # (256, A+1)
    wh = jnp.pad(wh, ((0, 0), (0, pad_cols)))                                  # (256, 128)
    bh = jnp.concatenate([p["ba2"] + p["bv2"], p["bv2"]], axis=1)              # (1, A+1)
    bh = jnp.pad(bh, ((0, 0), (0, pad_cols)))                                  # (1, 128)

    # W1 (rows zero-padded to a bf16 sublane multiple) stacked onto the head.
    w1_pad = jnp.pad(p["w1"], ((0, s_pad - state_size), (0, 0)))
    wfold = jnp.concatenate([w1_pad, wh], axis=0).astype(jnp.bfloat16)         # (s_pad+256,128)

    # Column mask for the advantage mean (+1 adv columns, -A value column).
    colmask = jnp.concatenate([
        jnp.ones((1, action_size), f32),
        jnp.full((1, 1), -float(action_size), f32),
        jnp.zeros((1, pad_cols), f32)], axis=1)                                # (1, 128)

    bias = jnp.concatenate([p["b1"], bb1, bh, colmask], axis=1)                # (1, 640)

    return dict(wfold=wfold, wb1=wb1, bias=bias, action_size=action_size)


@functools.partial(jax.jit, static_argnames=("action_size",))
def _qnet_forward(state, wfold, wb1, bias, *, action_size):
    b, s = state.shape
    s_pad = wfold.shape[0] - 2 * HIDDEN
    p_out = wfold.shape[1]
    bp = _round_up(b, SUBLANE)
    x = jnp.pad(state, ((0, bp - b), (0, s_pad - s)))

    out = pl.pallas_call(
        functools.partial(_qnet_kernel, b_real=b, action_size=action_size),
        out_shape=jax.ShapeDtypeStruct((bp, p_out), jnp.float32),
        in_specs=[pl.BlockSpec(memory_space=pltpu.MemorySpace.VMEM)] * 4,
        out_specs=pl.BlockSpec(memory_space=pltpu.MemorySpace.VMEM),
    )(x, wfold, wb1, bias)
    return out[:b, :action_size]


def qnetwork_forward(state, fused):
    """state: (B, state_size) f32.  fused: output of fuse_params()."""
    return _qnet_forward(state, fused["wfold"], fused["wb1"], fused["bias"],
                         action_size=fused["action_size"])


def init_params(key, state_size, action_size):
    """Deterministic init mimicking torch.nn.Linear's U(-1/sqrt(fan_in), ...).
    Weights are (in, out); biases are (1, out)."""
    def linear(k, fan_in, fan_out):
        kw, kb = jax.random.split(k)
        bound = 1.0 / jnp.sqrt(jnp.float32(fan_in))
        w = jax.random.uniform(kw, (fan_in, fan_out), jnp.float32, -bound, bound)
        b = jax.random.uniform(kb, (1, fan_out), jnp.float32, -bound, bound)
        return w, b

    keys = jax.random.split(key, 5)
    w1, b1 = linear(keys[0], state_size, HIDDEN)
    wa1, ba1 = linear(keys[1], HIDDEN, HIDDEN)
    wa2, ba2 = linear(keys[2], HIDDEN, action_size)
    wv1, bv1 = linear(keys[3], HIDDEN, HIDDEN)
    wv2, bv2 = linear(keys[4], HIDDEN, 1)
    return dict(w1=w1, b1=b1, wa1=wa1, ba1=ba1, wa2=wa2, ba2=ba2,
                wv1=wv1, bv1=bv1, wv2=wv2, bv2=bv2)


def qnetwork_ref(state, p, dtype=jnp.float32):
    """Pure-JAX reference mirroring the PyTorch forward. dtype=bfloat16 mimics
    the kernel's bf16 weight/activation rounding (f32 accumulation either way)."""
    def lin(x, w, b):
        return jnp.dot(x.astype(dtype), w.astype(dtype),
                       preferred_element_type=jnp.float32) + b
    h = jax.nn.relu(lin(state, p["w1"], p["b1"]))
    adv = lin(jax.nn.relu(lin(h, p["wa1"], p["ba1"])), p["wa2"], p["ba2"])
    val = lin(jax.nn.relu(lin(h, p["wv1"], p["bv1"])), p["wv2"], p["bv2"])
    return val + adv - jnp.mean(adv)


if __name__ == "__main__":
    B, STATE_SIZE, ACTION_SIZE = 2, 8, 4

    key = jax.random.PRNGKey(0)
    k_params, k_state = jax.random.split(key)
    params = init_params(k_params, STATE_SIZE, ACTION_SIZE)
    fused = fuse_params(params)
    state = jax.random.normal(k_state, (B, STATE_SIZE), jnp.float32)

    out = qnetwork_forward(state, fused)
    out = jax.block_until_ready(out)
    assert out.shape == (B, ACTION_SIZE), out.shape

    # Tight check vs. a reference with matching bf16 weight/activation rounding
    # (catches fusion / masking / mean bugs).
    ref_bf16 = qnetwork_ref(state, params, dtype=jnp.bfloat16)
    assert jnp.allclose(out, ref_bf16, atol=5e-3, rtol=5e-3), (out, ref_bf16)

    # Loose check vs. the exact f32 torch-equivalent forward (only bf16
    # weight-storage drift remains).
    ref_f32 = qnetwork_ref(state, params, dtype=jnp.float32)
    assert jnp.allclose(out, ref_f32, atol=5e-2, rtol=5e-2), (out, ref_f32)

    print("KERNEL_OK")
</pallas_src>

<mosaic_0001>
module attributes {stable_mosaic.version = 11 : i64} {
  func.func @_qnet_kernel(%arg0: memref<8x16xf32, #tpu.memory_space<vmem>>, %arg1: memref<272x128xbf16, #tpu.memory_space<vmem>>, %arg2: memref<128x256xbf16, #tpu.memory_space<vmem>>, %arg3: memref<1x640xf32, #tpu.memory_space<vmem>>, %arg4: memref<8x128xf32, #tpu.memory_space<vmem>>) attributes {dimension_semantics = [], scalar_prefetch = 0 : i64, scratch_operands = 0 : i64, tpu.core_type = #tpu.core_type<tc>} {
    %c0 = arith.constant 0 : index
    %c0_0 = arith.constant 0 : index
    %0 = vector.load %arg1[%c0, %c0_0] : memref<272x128xbf16, #tpu.memory_space<vmem>>, vector<16x128xbf16>
    %c16 = arith.constant 16 : index
    %c0_1 = arith.constant 0 : index
    %1 = vector.load %arg1[%c16, %c0_1] : memref<272x128xbf16, #tpu.memory_space<vmem>>, vector<256x128xbf16>
    %c0_2 = arith.constant 0 : index
    %c0_3 = arith.constant 0 : index
    %2 = vector.load %arg3[%c0_2, %c0_3] : memref<1x640xf32, #tpu.memory_space<vmem>>, vector<1x128xf32>
    %c0_4 = arith.constant 0 : index
    %c128 = arith.constant 128 : index
    %3 = vector.load %arg3[%c0_4, %c128] : memref<1x640xf32, #tpu.memory_space<vmem>>, vector<1x256xf32>
    %c0_5 = arith.constant 0 : index
    %c384 = arith.constant 384 : index
    %4 = vector.load %arg3[%c0_5, %c384] : memref<1x640xf32, #tpu.memory_space<vmem>>, vector<1x128xf32>
    %c0_6 = arith.constant 0 : index
    %c512 = arith.constant 512 : index
    %5 = vector.load %arg3[%c0_6, %c512] : memref<1x640xf32, #tpu.memory_space<vmem>>, vector<1x128xf32>
    %c0_7 = arith.constant 0 : index
    %c0_8 = arith.constant 0 : index
    %6 = vector.load %arg0[%c0_7, %c0_8] : memref<8x16xf32, #tpu.memory_space<vmem>>, vector<8x16xf32>
    %7 = arith.truncf %6 : vector<8x16xf32> to vector<8x16xbf16>
    %cst = arith.constant dense<0.000000e+00> : vector<8x128xf32>
    %8 = tpu.matmul %7, %0, %cst {dimension_numbers = #tpu.dot_dimension_numbers<[1], [0], [0], [1], [0, 0, 1, 1], [], []>} : vector<8x16xbf16>, vector<16x128xbf16>, vector<8x128xf32> -> vector<8x128xf32>
    %9 = vector.broadcast %2 : vector<1x128xf32> to vector<8x128xf32>
    %10 = arith.addf %8, %9 : vector<8x128xf32>
    %cst_9 = arith.constant 0.000000e+00 : f32
    %11 = vector.broadcast %cst_9 : f32 to vector<8x128xf32>
    %12 = arith.maximumf %10, %11 : vector<8x128xf32>
    %13 = arith.truncf %12 : vector<8x128xf32> to vector<8x128xbf16>
    %c0_10 = arith.constant 0 : index
    %c0_11 = arith.constant 0 : index
    %14 = vector.load %arg2[%c0_10, %c0_11] : memref<128x256xbf16, #tpu.memory_space<vmem>>, vector<128x256xbf16>
    %cst_12 = arith.constant dense<0.000000e+00> : vector<8x256xf32>
    %15 = tpu.matmul %13, %14, %cst_12 {dimension_numbers = #tpu.dot_dimension_numbers<[1], [0], [0], [1], [0, 0, 1, 1], [], []>} : vector<8x128xbf16>, vector<128x256xbf16>, vector<8x256xf32> -> vector<8x256xf32>
    %16 = vector.broadcast %3 : vector<1x256xf32> to vector<8x256xf32>
    %17 = arith.addf %15, %16 : vector<8x256xf32>
    %cst_13 = arith.constant 0.000000e+00 : f32
    %18 = vector.broadcast %cst_13 : f32 to vector<8x256xf32>
    %19 = arith.maximumf %17, %18 : vector<8x256xf32>
    %20 = arith.truncf %19 : vector<8x256xf32> to vector<8x256xbf16>
    %cst_14 = arith.constant dense<0.000000e+00> : vector<8x128xf32>
    %21 = tpu.matmul %20, %1, %cst_14 {dimension_numbers = #tpu.dot_dimension_numbers<[1], [0], [0], [1], [0, 0, 1, 1], [], []>} : vector<8x256xbf16>, vector<256x128xbf16>, vector<8x128xf32> -> vector<8x128xf32>
    %22 = vector.broadcast %4 : vector<1x128xf32> to vector<8x128xf32>
    %23 = arith.addf %21, %22 : vector<8x128xf32>
    %24 = tpu.iota {dimensions = array<i32: 0>} : vector<8x1xi32>
    %c2_i32 = arith.constant 2 : i32
    %25 = vector.broadcast %c2_i32 : i32 to vector<8x1xi32>
    %26 = arith.cmpi slt, %24, %25 : vector<8x1xi32>
    %cst_15 = arith.constant 1.000000e+00 : f32
    %cst_16 = arith.constant 0.000000e+00 : f32
    %27 = vector.broadcast %cst_15 : f32 to vector<8x1xf32>
    %28 = vector.broadcast %cst_16 : f32 to vector<8x1xf32>
    %29 = arith.select %26, %27, %28 : vector<8x1xi1>, vector<8x1xf32>
    %30 = vector.broadcast %5 : vector<1x128xf32> to vector<8x128xf32>
    %31 = arith.mulf %23, %30 : vector<8x128xf32>
    %cst_17 = arith.constant dense<0.000000e+00> : vector<8xf32>
    %32 = vector.multi_reduction <add>, %31, %cst_17 [1] : vector<8x128xf32> to vector<8xf32>
    %33 = vector.shape_cast %32 : vector<8xf32> to vector<8x1xf32>
    %34 = arith.mulf %33, %29 : vector<8x1xf32>
    %cst_18 = arith.constant dense<0.000000e+00> : vector<1xf32>
    %35 = vector.multi_reduction <add>, %34, %cst_18 [0] : vector<8x1xf32> to vector<1xf32>
    %36 = vector.shape_cast %35 : vector<1xf32> to vector<1x1xf32>
    %cst_19 = arith.constant 1.250000e-01 : f32
    %37 = vector.broadcast %cst_19 : f32 to vector<1x1xf32>
    %38 = arith.mulf %36, %37 : vector<1x1xf32>
    %39 = vector.broadcast %38 : vector<1x1xf32> to vector<8x128xf32>
    %40 = arith.subf %23, %39 : vector<8x128xf32>
    %c0_20 = arith.constant 0 : index
    %c0_21 = arith.constant 0 : index
    %41 = vector.load %arg4[%c0_20, %c0_21] : memref<8x128xf32, #tpu.memory_space<vmem>>, vector<8x128xf32>
    tpu.vector_store %arg4[%c0_20, %c0_21], %40 {strides = array<i32>} : memref<8x128xf32, #tpu.memory_space<vmem>>, vector<8x128xf32>,
    return
  }
}

</mosaic_0001>

<bundles_post_ra>
// kernel: _qnet_forward.1
= control target key start
LH: loop header
LB: loop body
LE: loop exit
PB: predicated region body
PF: predicated region fallthrough
CT: control target
= control target key end

     0   :  { %9 = vsyncpa [#allocation3], 0  ;;  %s685_s0 = inlined_call_operand.vmem [shape: f32[8,16], index: 0, kind: input, shape index: {}]   ;;  %s686_s1 = inlined_call_operand.hbm [shape: bf16[272,128], index: 1, kind: input, shape index: {}]   ;;  %s687_s2 = inlined_call_operand.hbm [shape: bf16[128,256], index: 2, kind: input, shape index: {}]   ;;  %s688_s3 = inlined_call_operand.vmem [shape: f32[1,640], index: 3, kind: input, shape index: {}]   ;;  %s689_s4 = inlined_call_operand.vmem [shape: f32[8,128], index: 4, kind: output, shape index: {}]  }
   0x1   :  { %s17_s17 = sshll.u32 %s686_s1, 4  ;;  %s18_s17 = int_to_ptr.hbm [resolvable:$true] %s17_s17 }
   0x2   :  { %10 = vsyncpa [#allocation5], 0  ;;  %s628_s18 = smov [#allocation2]   ;;  %s30_s22 = sshll.u32 %s687_s2, 4  ;;  %s31_s22 = int_to_ptr.hbm [resolvable:$true] %s30_s22 }
   0x3   :  { %s19_s19 = sshll.u32 %s628_s18, 4  ;;  %s629_s23 = smov 64   ;;  %s20_s19 = int_to_ptr.vmem [resolvable:$true] %s19_s19 }
   0x4   :  { %s630_s24 = smov 4   ;;  %s631_s25 = smov [#allocation4]  }
   0x5   :  { %25 = dma.hbm_to_vmem [thread:$0]  %s18_s17, 2176, %s20_s19, [#allocation3], %s629_s23, %s629_s23, %s630_s24  }
   0x6   :  { %s32_s26 = sshll.u32 %s631_s25, 4  ;;  %s632_s27 = smov 128   ;;  %s33_s26 = int_to_ptr.vmem [resolvable:$true] %s32_s26 }
   0x7   :  { %s633_s28 = smov 8  }
   0x8   :  { %38 = dma.hbm_to_vmem [thread:$0]  %s31_s22, 2048, %s33_s26, [#allocation5], %s632_s27, %s632_s27, %s633_s28  }
   0x9   :  { %624 = dma.done.wait [#allocation3], 2176  }
   0xa   :  { %625 = vsyncadd [#allocation3], 4294965120 }
   0xb   :  { %626 = dma.done.wait [#allocation5], 2048  }
   0xc   :  { %627 = vsyncadd [#allocation5], 4294965248  ;;  %v533_v0 = vld [vmem:[#allocation2] sm:$0xff]  ;;  %vm99_vm0 = vcmask 130048   ;;  %v463_v2 = vld [vmem:[#allocation4 + $0x70] sm:$0xf] }
   0xd   :  { %v88_v1 = vld [vmem:[%s685_s0] sm:$0xff]  ;;  %v564_v5 = vld [vmem:[#allocation4 + $0x74] sm:$0xf]  ;;  %110 = vmatpush.bf16.msra.mxu0 %v533_v0  ;;  %v455_v9 = vld [vmem:[#allocation4 + $0x60] sm:$0xf] }
   0xe   :  { %v89_v3 = vpack.c.bf16 %v88_v1, %v88_v1  ;;  %v565_v4 = vld [vmem:[#allocation4 + $0x74] sm:$0xf0]  ;;  %v465_v6 = vld [vmem:[#allocation4 + $0x78] sm:$0xf0]  ;;  %v563_v10 = vld [vmem:[#allocation4 + $0x64] sm:$0xf0] }
   0xf   :  { %v464_v7 = vor.u32 %v565_v4, %v463_v2  ;;  %v468_v8 = vor.u32 %v564_v5, %v465_v6  ;;  %v562_v11 = vld [vmem:[#allocation4 + $0x64] sm:$0xf]  ;;  %v457_v12 = vld [vmem:[#allocation4 + $0x68] sm:$0xf0]  ;;  %v456_v13 = vor.u32 %v563_v10, %v455_v9  ;;  %v447_v15 = vld [vmem:[#allocation4 + $0x50] sm:$0xf] }
  0x10   :  { %v460_v14 = vor.u32 %v562_v11, %v457_v12  ;;  %404 = vmatmul.msk.bf16.vlgmr.msra.gmra.mxu0 %vm99_vm0, %v89_v3  ;;  %v561_v16 = vld [vmem:[#allocation4 + $0x54] sm:$0xf0]  ;;  %v560_v17 = vld [vmem:[#allocation4 + $0x54] sm:$0xf]  ;;  %v449_v18 = vld [vmem:[#allocation4 + $0x58] sm:$0xf0] }
  0x11   :  { %219 = vmatpush.bf16.msra.mxu1 %v464_v7  ;;  %232 = vmatpush.bf16.msra.mxu2 %v468_v8  ;;  %v439_v19 = vld [vmem:[#allocation4 + $0x40] sm:$0xf]  ;;  %v448_v20 = vor.u32 %v561_v16, %v447_v15  ;;  %v452_v21 = vor.u32 %v560_v17, %v449_v18  ;;  %v559_v22 = vld [vmem:[#allocation4 + $0x44] sm:$0xf0]  ;;  %v558_v23 = vld [vmem:[#allocation4 + $0x44] sm:$0xf] }
  0x12   :  { %v441_v24 = vld [vmem:[#allocation4 + $0x48] sm:$0xf0]  ;;  %v440_v25 = vor.u32 %v559_v22, %v439_v19  ;;  %v431_v27 = vld [vmem:[#allocation4 + $0x30] sm:$0xf]  ;;  %v557_v28 = vld [vmem:[#allocation4 + $0x34] sm:$0xf0] }
  0x13   :  { %v444_v26 = vor.u32 %v558_v23, %v441_v24  ;;  %v556_v29 = vld [vmem:[#allocation4 + $0x34] sm:$0xf]  ;;  %v433_v30 = vld [vmem:[#allocation4 + $0x38] sm:$0xf0]  ;;  %v432_v31 = vor.u32 %v557_v28, %v431_v27  ;;  %v423_v33 = vld [vmem:[#allocation4 + $0x20] sm:$0xf] }
  0x14   :  { %v436_v32 = vor.u32 %v556_v29, %v433_v30  ;;  %v555_v34 = vld [vmem:[#allocation4 + $0x24] sm:$0xf0]  ;;  %v554_v35 = vld [vmem:[#allocation4 + $0x24] sm:$0xf]  ;;  %v425_v36 = vld [vmem:[#allocation4 + $0x28] sm:$0xf0] }
  0x15   :  { %220 = vmatpush.bf16.msra.mxu1 %v456_v13  ;;  %233 = vmatpush.bf16.msra.mxu2 %v460_v14  ;;  %v424_v37 = vor.u32 %v555_v34, %v423_v33  ;;  %v428_v38 = vor.u32 %v554_v35, %v425_v36  ;;  %v415_v39 = vld [vmem:[#allocation4 + $0x10] sm:$0xf]  ;;  %v553_v40 = vld [vmem:[#allocation4 + $0x14] sm:$0xf0]  ;;  %v552_v41 = vld [vmem:[#allocation4 + $0x14] sm:$0xf] }
  0x16   :  { %v416_v42 = vor.u32 %v553_v40, %v415_v39  ;;  %v417_v43 = vld [vmem:[#allocation4 + $0x18] sm:$0xf0]  ;;  %v407_v45 = vld [vmem:[#allocation4] sm:$0xf]  ;;  %v551_v46 = vld [vmem:[#allocation4 + $0x4] sm:$0xf0] }
  0x17   :  { %v420_v44 = vor.u32 %v552_v41, %v417_v43  ;;  %v550_v47 = vld [vmem:[#allocation4 + $0x4] sm:$0xf]  ;;  %v408_v48 = vor.u32 %v551_v46, %v407_v45  ;;  %v409_v49 = vld [vmem:[#allocation4 + $0x8] sm:$0xf0]  ;;  %v541_v51 = vld [vmem:[#allocation2 + $0x40] sm:$0xff]  ;;  %v634_v33 = vmov 0.0  }
  0x18   :  { %v412_v50 = vor.u32 %v550_v47, %v409_v49  ;;  %v549_v52 = vld [vmem:[#allocation2 + $0x80] sm:$0xff]  ;;  %348 = vmatpush.bf16.msra.mxu3 %v541_v51  ;;  %v540_v53 = vld [vmem:[#allocation2 + $0x38] sm:$0xff]  ;;  %v539_v55 = vld [vmem:[#allocation2 + $0x30] sm:$0xff] }
  0x19   :  { %221 = vmatpush.bf16.msra.mxu1 %v448_v20  ;;  %234 = vmatpush.bf16.msra.mxu2 %v452_v21  ;;  %v548_v54 = vld [vmem:[#allocation2 + $0x78] sm:$0xff]  ;;  %v547_v56 = vld [vmem:[#allocation2 + $0x70] sm:$0xff]  ;;  %v538_v57 = vld [vmem:[#allocation2 + $0x28] sm:$0xff] }
  0x1a   :  { %361 = vmatpush.bf16.msrb.mxu0 %v549_v52  ;;  %v546_v58 = vld [vmem:[#allocation2 + $0x68] sm:$0xff]  ;;  %v537_v59 = vld [vmem:[#allocation2 + $0x20] sm:$0xff]  ;;  %v536_v61 = vld [vmem:[#allocation2 + $0x18] sm:$0xff] }
  0x1b   :  { %v545_v60 = vld [vmem:[#allocation2 + $0x60] sm:$0xff]  ;;  %v535_v4 = vld [vmem:[#allocation2 + $0x10] sm:$0xff]  ;;  %v544_v5 = vld [vmem:[#allocation2 + $0x58] sm:$0xff] }
  0x1c   :  { %349 = vmatpush.bf16.msra.mxu3 %v540_v53  ;;  %v573_v62 = vld [vmem:[%s688_s3] ss:$0 sm:$0xff]  ;;  %v534_v6 = vld [vmem:[#allocation2 + $0x8] sm:$0xff]  ;;  %v543_v7 = vld [vmem:[#allocation2 + $0x50] sm:$0xff] }
  0x1d   :  { %222 = vmatpush.bf16.msra.mxu1 %v440_v25  ;;  %235 = vmatpush.bf16.msra.mxu2 %v444_v26  ;;  %v542_v8 = vld [vmem:[#allocation2 + $0x48] sm:$0xff]  ;;  %v85_v9 = vld [vmem:[%s688_s3 + $0x1] sm:$0x3]  ;;  %v574_v22 = vld [vmem:[%s688_s3 + $0x3] ss:$0 sm:$0xff] }
  0x1e   :  { %362 = vmatpush.bf16.msrb.mxu0 %v548_v54  ;;  %v135_v10 = vperm.slane %v85_v9, 0  ;;  %v136_v14 = vperm.slane %v85_v9, 1  ;;  %v575_v26 = vld [vmem:[%s688_s3 + $0x4] ss:$0 sm:$0xff] }
  0x20   :  { %350 = vmatpush.bf16.msra.mxu3 %v539_v55 }
  0x21   :  { %223 = vmatpush.bf16.msra.mxu1 %v432_v31  ;;  %236 = vmatpush.bf16.msra.mxu2 %v436_v32  ;;  %v374_v31 = vlaneseq }
  0x22   :  { %363 = vmatpush.bf16.msrb.mxu0 %v547_v56 }
  0x23   :  { %v375_v32 = vshrl.u32 %v374_v31, 7 }
  0x24   :  { %351 = vmatpush.bf16.msra.mxu3 %v538_v57 }
  0x25   :  { %224 = vmatpush.bf16.msra.mxu1 %v424_v37  ;;  %237 = vmatpush.bf16.msra.mxu2 %v428_v38  ;;  %vm376_vm1 = vcmp.lt.s32.totalorder %v375_v32, 2 }
  0x26   :  { %364 = vmatpush.bf16.msrb.mxu0 %v546_v58  ;;  %v377_v34 = vsel %vm376_vm1, 1.0, %v634_v33 }
  0x28   :  { %352 = vmatpush.bf16.msra.mxu3 %v537_v59 }
  0x29   :  { %225 = vmatpush.bf16.msra.mxu1 %v416_v42  ;;  %238 = vmatpush.bf16.msra.mxu2 %v420_v44 }
  0x2a   :  { %365 = vmatpush.bf16.msrb.mxu0 %v545_v60 }
  0x2c   :  { %353 = vmatpush.bf16.msra.mxu3 %v536_v61 }
  0x2d   :  { %226 = vmatpush.bf16.msra.mxu1 %v408_v48  ;;  %239 = vmatpush.bf16.msra.mxu2 %v412_v50 }
  0x2e   :  { %366 = vmatpush.bf16.msrb.mxu0 %v544_v5 }
  0x30   :  { %354 = vmatpush.bf16.msra.mxu3 %v535_v4 }
  0x32   :  { %367 = vmatpush.bf16.msrb.mxu0 %v543_v7 }
  0x34   :  { %355 = vmatpush.bf16.msra.mxu3 %v534_v6 }
  0x36   :  { %368 = vmatpush.bf16.msrb.mxu0 %v542_v8 }
  0x8d   :  { %v112_v63 = vpop.f32.mrf.mxu0 }
  0x8e   :  { %v113_v0 = vadd.f32 %v573_v62, %v112_v63 }
  0x90   :  { %v116_v1 = vmax.f32 %v113_v0, 0.0 }
  0x92   :  { %v117_v2 = vpack.c.bf16 %v116_v1, %v116_v1 }
  0x94   :  { %227 = vmatmul.bf16.vlgmr.msra.gmra.mxu1 %v117_v2  ;;  %240 = vmatmul.bf16.vlgmr.msra.gmra.mxu2 %v117_v2 }
  0x95   :  { %v114_v3 = vpop.f32.mrf.mxu0 }
 0x111   :  { %v228_v11 = vpop.f32.mrf.mxu1 }
 0x112   :  { %v229_v12 = vadd.f32 %v228_v11, %v135_v10 }
 0x114   :  { %v245_v13 = vmax.f32 %v229_v12, 0.0 }
 0x116   :  { %v247_v15 = vpack.c.bf16 %v245_v13, %v245_v13 }
 0x117   :  { %v241_v16 = vpop.f32.mrf.mxu2 }
 0x118   :  { %v242_v17 = vadd.f32 %v241_v16, %v136_v14  ;;  %356 = vmatmul.bf16.vlgmr.msra.gmra.mxu3 %v247_v15 }
 0x119   :  { %v230_v18 = vpop.f32.mrf.mxu1 }
 0x11a   :  { %v246_v19 = vmax.f32 %v242_v17, 0.0 }
 0x11c   :  { %v248_v20 = vpack.c.bf16 %v246_v19, %v246_v19 }
 0x11e   :  { %369 = vmatmul.bf16.vlgmr.msrb.gmra.mxu0 %v248_v20 }
 0x11f   :  { %v243_v21 = vpop.f32.mrf.mxu2 }
 0x19b   :  { %v357_v23 = vpop.f32.mrf.mxu3  ;;  %v370_v24 = vpop.f32.mrf.mxu0 }
 0x19c   :  { %v358_v25 = vadd.f32 %v574_v22, %v357_v23 }
 0x19e   :  { %v371_v27 = vadd.f32 %v370_v24, %v358_v25 }
 0x1a0   :  { %v381_v28 = vmul.f32 %v575_v26, %v371_v27 }
 0x1a2   :  { %382 = vadd.xlane.f32.xlu0 %v381_v28 }
 0x1a3   :  { %v359_v29 = vpop.f32.mrf.mxu3  ;;  %v372_v30 = vpop.f32.mrf.mxu0 }
 0x215   :  { %v383_v35 = vpop.xlane.xlu0 %382 }
 0x216   :  { %v384_v36 = vmul.f32 %v383_v35, %v377_v34 }
 0x218   :  { %v385_v37 = vrot.slane %v384_v36, 4 }
 0x21a   :  { %v386_v38 = vadd.f32 %v385_v37, %v384_v36 }
 0x21c   :  { %v387_v39 = vrot.slane %v386_v38, 2 }
 0x21e   :  { %v388_v40 = vadd.f32 %v387_v39, %v386_v38 }
 0x220   :  { %v389_v41 = vrot.slane %v388_v40, 1 }
 0x222   :  { %v390_v42 = vadd.f32 %v389_v41, %v388_v40 }
 0x224   :  { %v391_v43 = vmul.f32 0.125, %v390_v42 }
 0x226   :  { %v392_v44 = vsub.f32 %v371_v27, %v391_v43 }
 0x228   :  { %393 = vst [vmem:[%s689_s4] sm:$0xff] %v392_v44 }
 0x229   :  { %398 = vsyncpa [#allocation3], 1 }
 0x22a   :  { %399 = vsyncpa [#allocation5], 1 }

</bundles_post_ra>
